<compile_context>
chip_gen: v6e
topology: v6e:2x2x1
jax: 0.10.0
libtpu: 0.0.40
codegen_flags: <defaults>
</compile_context>

<pallas_src>
import functools
import math

import jax
import jax.numpy as jnp
from jax import lax
from jax.experimental import pallas as pl
from jax.experimental.pallas import tpu as pltpu


def _mha_kernel(q_ref, kT_ref, v_ref, mask_ref,
                wq_ref, bq_ref, wo_ref, bo_ref,
                out_ref, qa_ref, oh_ref,
                *, nhead, head_dim, compute_dtype):
    f32 = jnp.float32
    cd = compute_dtype
    dh = head_dim

    # Full-width Q projection (1/sqrt(dh) already folded into wq/bq by wrapper).
    q_all = jnp.dot(q_ref[...], wq_ref[...], preferred_element_type=f32) + bq_ref[...]
    qa_ref[...] = q_all.astype(cd)                 # lane-dense staging for per-head slices

    mask = mask_ref[...].astype(f32)               # bf16 stream -> f32 add (once, all heads)

    def head_at(h):
        off = h * dh
        if not isinstance(off, int):               # dynamic (pl.loop) path
            off = pl.multiple_of(off, dh)
        qh = qa_ref[:, pl.ds(off, dh)]                                      # (tq, dh)
        # K is pre-transposed head-major by the wrapper: plain (tq,dh)@(dh,Lk).
        s = jnp.dot(qh, kT_ref[h], preferred_element_type=f32) + mask       # (tq, Lk) f32
        s = s - jnp.max(s, axis=-1, keepdims=True)
        p = jnp.exp(s)
        # Deferred normalization: scale the (tq, dh) output, not the (tq, Lk) probs.
        r = pl.reciprocal(jnp.sum(p, axis=-1, keepdims=True), approx=True)  # EUP slot
        oh = jnp.dot(p.astype(cd), v_ref[h], preferred_element_type=f32)    # (tq, dh)
        oh_ref[:, pl.ds(off, dh)] = (oh * r).astype(oh_ref.dtype)

    if nhead <= 8:
        for h in range(nhead):                     # small H: static unroll
            head_at(h)
    else:
        @pl.loop(0, nhead)                         # large H: visible loop, bounded live ranges
        def _(h):
            head_at(h)

    # Single full-width output projection over the lane-dense packed heads.
    out = jnp.dot(oh_ref[...], wo_ref[...], preferred_element_type=f32) + bo_ref[...]
    out_ref[...] = out.astype(out_ref.dtype)


def multi_head_attention(q, k, v, att_mask, params, nhead, *,
                         block_q=256, compute_dtype=jnp.bfloat16,
                         out_dtype=None, kv_buffers=2):
    """q: (B, Lq, D); k, v: (B, Lk, D); att_mask: (Lq, Lk) additive mask (or None).

    params = (wq, bq, wk, bk, wv, bv, wo, bo) with weights as (D_in, D_out),
    i.e. y = x @ W + b (transpose of PyTorch nn.Linear weight layout).
    kv_buffers=1 single-buffers the per-batch K/V blocks (stall only at batch
    boundaries) to save VMEM on v7x; block_q can be raised on v6e (128 MiB VMEM).
    """
    wq, bq, wk, bk, wv, bv, wo, bo = params
    B, Lq, D = q.shape
    Lk = k.shape[1]
    assert D % nhead == 0, "ndim must be divisible by nhead"
    assert block_q % 8 == 0, "block_q must be a multiple of 8"
    dh = D // nhead
    scale = 1.0 / math.sqrt(dh)
    out_dtype = q.dtype if out_dtype is None else out_dtype
    f32 = jnp.float32

    # ---- hoisted K / V projections (once per forward, full-width XLA matmuls) ----
    k_proj = jnp.dot(k.astype(f32), wk.astype(f32)) + bk.reshape(1, D).astype(f32)
    v_proj = jnp.dot(v.astype(f32), wv.astype(f32)) + bv.reshape(1, D).astype(f32)
    # Head-major; K pre-transposed so the score matmul is (tq,dh)@(dh,Lk).
    kT_hm = k_proj.reshape(B, Lk, nhead, dh).transpose(0, 2, 3, 1).astype(compute_dtype)
    v_hm = v_proj.reshape(B, Lk, nhead, dh).transpose(0, 2, 1, 3).astype(compute_dtype)

    # ---- Q-side operands (Q projection happens in-kernel, per query tile) ----
    wq_s = (wq * scale).astype(compute_dtype)            # (D, D), softmax scale folded in
    bq_s = (bq * scale).reshape(1, D).astype(f32)
    wo_c = wo.astype(compute_dtype)                      # (D, D) full-width output proj
    bo_f = bo.reshape(1, D).astype(f32)

    if att_mask is None:
        att_mask = jnp.zeros((Lq, Lk), f32)
    mask_c = att_mask.astype(compute_dtype)              # bf16 mask stream
    q_c = q.astype(compute_dtype)

    # ---- query tiling: pad Lq to a multiple of tq (no unbounded tq=Lq fallback) ----
    tq = Lq if Lq <= block_q else block_q
    Lq_pad = ((Lq + tq - 1) // tq) * tq
    if Lq_pad != Lq:
        q_c = jnp.pad(q_c, ((0, 0), (0, Lq_pad - Lq), (0, 0)))
        mask_c = jnp.pad(mask_c, ((0, Lq_pad - Lq), (0, 0)))
    n_q = Lq_pad // tq

    # ---- VMEM budget derived from actual tile sizes ----
    cb = jnp.dtype(compute_dtype).itemsize
    ob = jnp.dtype(out_dtype).itemsize
    vmem_est = (
        kv_buffers * 2 * Lk * D * cb          # K^T + V per-batch blocks
        + 2 * tq * D * cb                     # double-buffered q tile
        + 2 * tq * Lk * cb                    # double-buffered mask tile
        + 2 * tq * D * ob                     # double-buffered output tile
        + 2 * D * D * cb + 2 * D * 4          # resident wq, wo + biases
        + 2 * tq * D * cb                     # qa / oh scratches
        + 3 * tq * Lk * 4 + 2 * tq * D * 4    # f32 score / exp / acc temporaries
    )
    if vmem_est > 96 * 1024 * 1024:
        # TODO(synk): flash-style online-softmax path over Lk blocks for long context.
        raise NotImplementedError(
            f"working set ~{vmem_est >> 20} MiB exceeds VMEM budget; "
            "long-context (Lk-blocked) path not implemented")
    vmem_limit = int(min(max(2 * vmem_est, 32 * 1024 * 1024), 100 * 1024 * 1024))

    kernel = functools.partial(_mha_kernel, nhead=nhead, head_dim=dh,
                               compute_dtype=compute_dtype)

    # Grid-invariant operands: whole-array VMEM residents (no double buffering).
    resident = pl.BlockSpec(memory_space=pltpu.MemorySpace.VMEM)

    def kv_spec(block_shape):
        idx = lambda b, i: (b, 0, 0, 0)
        if kv_buffers == 2:
            return pl.BlockSpec(block_shape, idx)
        # Single-buffered K/V (block changes only at batch boundaries) -> less VMEM (v7x).
        return pl.BlockSpec(block_shape, idx, pipeline_mode=pl.Buffered(kv_buffers))

    grid_spec = pltpu.PrefetchScalarGridSpec(
        num_scalar_prefetch=0,
        grid=(B, n_q),
        in_specs=[
            pl.BlockSpec((None, tq, D), lambda b, i: (b, i, 0)),   # q tile
            kv_spec((None, nhead, dh, Lk)),                        # K^T head-major (projected)
            kv_spec((None, nhead, Lk, dh)),                        # V head-major (projected)
            pl.BlockSpec((tq, Lk), lambda b, i: (i, 0)),           # additive mask tile (bf16)
            resident, resident,                                     # wq, bq
            resident, resident,                                     # wo, bo
        ],
        out_specs=pl.BlockSpec((None, tq, D), lambda b, i: (b, i, 0)),
        scratch_shapes=[
            pltpu.VMEM((tq, D), compute_dtype),   # staged projected Q (lane-dense)
            pltpu.VMEM((tq, D), compute_dtype),   # packed per-head outputs
        ],
    )

    out = pl.pallas_call(
        kernel,
        out_shape=jax.ShapeDtypeStruct((B, Lq_pad, D), out_dtype),
        grid_spec=grid_spec,
        compiler_params=pltpu.CompilerParams(
            # Both axes parallel: shards the grid across the two TensorCores on
            # v7x.  If profiling shows duplicated K/V HBM reads when the i sweep
            # splits across cores, switch the second axis to "arbitrary".
            dimension_semantics=("parallel", "parallel"),
            vmem_limit_bytes=vmem_limit,
        ),
    )(q_c, kT_hm, v_hm, mask_c, wq_s, bq_s, wo_c, bo_f)

    return out[:, :Lq, :] if Lq_pad != Lq else out


def reference_mha(q, k, v, att_mask, params, nhead):
    """Pure-JAX (f32) reference matching the PyTorch module semantics."""
    wq, bq, wk, bk, wv, bv, wo, bo = params
    B, Lq, D = q.shape
    dh = D // nhead
    xq = q @ wq + bq
    xk = k @ wk + bk
    xv = v @ wv + bv
    # split(dim=2) + stack(dim=1) == reshape + transpose
    xq = xq.reshape(B, Lq, nhead, dh).transpose(0, 2, 1, 3)
    xk = xk.reshape(B, -1, nhead, dh).transpose(0, 2, 1, 3)
    xv = xv.reshape(B, -1, nhead, dh).transpose(0, 2, 1, 3)
    s = jnp.einsum('bhqd,bhkd->bhqk', xq, xk) / math.sqrt(dh) + att_mask
    p = jax.nn.softmax(s, axis=-1)
    o = jnp.einsum('bhqk,bhkd->bhqd', p, xv)
    o = o.transpose(0, 2, 1, 3).reshape(B, Lq, D)
    return o @ wo + bo


if __name__ == "__main__":
    B, L, D, NHEAD = 2, 8, 32, 4

    key = jax.random.PRNGKey(0)
    keys = jax.random.split(key, 12)
    w_scale = 1.0 / math.sqrt(D)

    # Deterministic synthetic parameters (shapes per nn.Linear(ndim, ndim)).
    wq = jax.random.normal(keys[0], (D, D), jnp.float32) * w_scale
    bq = jax.random.normal(keys[1], (1, D), jnp.float32) * w_scale
    wk = jax.random.normal(keys[2], (D, D), jnp.float32) * w_scale
    bk = jax.random.normal(keys[3], (1, D), jnp.float32) * w_scale
    wv = jax.random.normal(keys[4], (D, D), jnp.float32) * w_scale
    bv = jax.random.normal(keys[5], (1, D), jnp.float32) * w_scale
    wo = jax.random.normal(keys[6], (D, D), jnp.float32) * w_scale
    bo = jax.random.normal(keys[7], (1, D), jnp.float32) * w_scale
    params = (wq, bq, wk, bk, wv, bv, wo, bo)

    q = jax.random.normal(keys[8], (B, L, D), jnp.float32)
    k = jax.random.normal(keys[9], (B, L, D), jnp.float32)
    v = jax.random.normal(keys[10], (B, L, D), jnp.float32)

    # Additive causal attention mask (finite large negative, broadcast over B, H).
    causal = jnp.tril(jnp.ones((L, L), jnp.float32))
    att_mask = jnp.where(causal > 0, 0.0, -1e9).astype(jnp.float32)

    out = multi_head_attention(q, k, v, att_mask, params, NHEAD)
    out = jax.block_until_ready(out)

    ref = reference_mha(q, k, v, att_mask, params, NHEAD)
    assert out.shape == (B, L, D)
    # Tolerance accounts for bf16 MXU inputs / bf16 mask + EUP approx reciprocal
    # vs the f32 reference; structural errors would be O(1) and still be caught.
    assert jnp.allclose(out, ref, atol=1e-1, rtol=1e-1), "mismatch vs reference"

    print("KERNEL_OK")
</pallas_src>

<mosaic_0001>
module attributes {stable_mosaic.version = 11 : i64} {
  func.func @_mha_kernel(%arg0: i32, %arg1: i32, %arg2: memref<1x8x32xbf16, #tpu.memory_space<vmem>>, %arg3: memref<1x4x8x8xbf16, #tpu.memory_space<vmem>>, %arg4: memref<1x4x8x8xbf16, #tpu.memory_space<vmem>>, %arg5: memref<8x8xbf16, #tpu.memory_space<vmem>>, %arg6: memref<32x32xbf16, #tpu.memory_space<vmem>>, %arg7: memref<1x32xf32, #tpu.memory_space<vmem>>, %arg8: memref<32x32xbf16, #tpu.memory_space<vmem>>, %arg9: memref<1x32xf32, #tpu.memory_space<vmem>>, %arg10: memref<1x8x32xf32, #tpu.memory_space<vmem>>, %arg11: memref<8x32xbf16, #tpu.memory_space<vmem>>, %arg12: memref<8x32xbf16, #tpu.memory_space<vmem>>) attributes {dimension_semantics = [#tpu.dimension_semantics<parallel>, #tpu.dimension_semantics<parallel>], iteration_bounds = array<i64: 2, 1>, scalar_prefetch = 0 : i64, scratch_operands = 2 : i64, tpu.core_type = #tpu.core_type<tc>, window_params = [{transform_indices = @transform_0, window_bounds = array<i64: 1, 8, 32>}, {transform_indices = @transform_1, window_bounds = array<i64: 1, 4, 8, 8>}, {transform_indices = @transform_2, window_bounds = array<i64: 1, 4, 8, 8>}, {transform_indices = @transform_3, window_bounds = array<i64: 8, 8>}, {pipeline_mode = #tpu.pipeline_mode<synchronous>, transform_indices = @transform_4, window_bounds = array<i64: 32, 32>}, {pipeline_mode = #tpu.pipeline_mode<synchronous>, transform_indices = @transform_5, window_bounds = array<i64: 1, 32>}, {pipeline_mode = #tpu.pipeline_mode<synchronous>, transform_indices = @transform_6, window_bounds = array<i64: 32, 32>}, {pipeline_mode = #tpu.pipeline_mode<synchronous>, transform_indices = @transform_7, window_bounds = array<i64: 1, 32>}, {transform_indices = @transform_8, window_bounds = array<i64: 1, 8, 32>}]} {
    %c0 = arith.constant 0 : index
    %c0_0 = arith.constant 0 : index
    %c0_1 = arith.constant 0 : index
    %0 = vector.load %arg2[%c0, %c0_0, %c0_1] : memref<1x8x32xbf16, #tpu.memory_space<vmem>>, vector<1x8x32xbf16>
    %1 = vector.shape_cast %0 : vector<1x8x32xbf16> to vector<8x32xbf16>
    %c0_2 = arith.constant 0 : index
    %c0_3 = arith.constant 0 : index
    %2 = vector.load %arg6[%c0_2, %c0_3] : memref<32x32xbf16, #tpu.memory_space<vmem>>, vector<32x32xbf16>
    %cst = arith.constant dense<0.000000e+00> : vector<8x32xf32>
    %3 = tpu.matmul %1, %2, %cst {dimension_numbers = #tpu.dot_dimension_numbers<[1], [0], [0], [1], [0, 0, 1, 1], [], []>} : vector<8x32xbf16>, vector<32x32xbf16>, vector<8x32xf32> -> vector<8x32xf32>
    %c0_4 = arith.constant 0 : index
    %c0_5 = arith.constant 0 : index
    %4 = vector.load %arg7[%c0_4, %c0_5] : memref<1x32xf32, #tpu.memory_space<vmem>>, vector<1x32xf32>
    %5 = vector.broadcast %4 : vector<1x32xf32> to vector<8x32xf32>
    %6 = arith.addf %3, %5 : vector<8x32xf32>
    %7 = arith.truncf %6 : vector<8x32xf32> to vector<8x32xbf16>
    %c0_6 = arith.constant 0 : index
    %c0_7 = arith.constant 0 : index
    %8 = vector.load %arg11[%c0_6, %c0_7] : memref<8x32xbf16, #tpu.memory_space<vmem>>, vector<8x32xbf16>
    tpu.vector_store %arg11[%c0_6, %c0_7], %7 {strides = array<i32>} : memref<8x32xbf16, #tpu.memory_space<vmem>>, vector<8x32xbf16>,
    %c0_8 = arith.constant 0 : index
    %c0_9 = arith.constant 0 : index
    %9 = vector.load %arg5[%c0_8, %c0_9] : memref<8x8xbf16, #tpu.memory_space<vmem>>, vector<8x8xbf16>
    %10 = arith.extf %9 : vector<8x8xbf16> to vector<8x8xf32>
    %c0_10 = arith.constant 0 : index
    %c0_11 = arith.constant 0 : index
    %11 = vector.load %arg11[%c0_10, %c0_11] : memref<8x32xbf16, #tpu.memory_space<vmem>>, vector<8x8xbf16>
    %c0_12 = arith.constant 0 : index
    %c0_13 = arith.constant 0 : index
    %c0_14 = arith.constant 0 : index
    %c0_15 = arith.constant 0 : index
    %12 = vector.load %arg3[%c0_12, %c0_13, %c0_14, %c0_15] : memref<1x4x8x8xbf16, #tpu.memory_space<vmem>>, vector<1x1x8x8xbf16>
    %13 = vector.shape_cast %12 : vector<1x1x8x8xbf16> to vector<8x8xbf16>
    %cst_16 = arith.constant dense<0.000000e+00> : vector<8x8xf32>
    %14 = tpu.matmul %11, %13, %cst_16 {dimension_numbers = #tpu.dot_dimension_numbers<[1], [0], [0], [1], [0, 0, 1, 1], [], []>} : vector<8x8xbf16>, vector<8x8xbf16>, vector<8x8xf32> -> vector<8x8xf32>
    %15 = arith.addf %14, %10 : vector<8x8xf32>
    %cst_17 = arith.constant dense<0xFF800000> : vector<8xf32>
    %16 = vector.multi_reduction <maximumf>, %15, %cst_17 [1] : vector<8x8xf32> to vector<8xf32>
    %17 = vector.shape_cast %16 : vector<8xf32> to vector<8x1xf32>
    %18 = vector.broadcast %17 : vector<8x1xf32> to vector<8x8xf32>
    %19 = arith.subf %15, %18 : vector<8x8xf32>
    %20 = math.exp %19 : vector<8x8xf32>
    %cst_18 = arith.constant dense<0.000000e+00> : vector<8xf32>
    %21 = vector.multi_reduction <add>, %20, %cst_18 [1] : vector<8x8xf32> to vector<8xf32>
    %22 = vector.shape_cast %21 : vector<8xf32> to vector<8x1xf32>
    %23 = tpu.reciprocal %22 {approx = true} : vector<8x1xf32> -> vector<8x1xf32>
    %24 = arith.truncf %20 : vector<8x8xf32> to vector<8x8xbf16>
    %c0_19 = arith.constant 0 : index
    %c0_20 = arith.constant 0 : index
    %c0_21 = arith.constant 0 : index
    %c0_22 = arith.constant 0 : index
    %25 = vector.load %arg4[%c0_19, %c0_20, %c0_21, %c0_22] : memref<1x4x8x8xbf16, #tpu.memory_space<vmem>>, vector<1x1x8x8xbf16>
    %26 = vector.shape_cast %25 : vector<1x1x8x8xbf16> to vector<8x8xbf16>
    %cst_23 = arith.constant dense<0.000000e+00> : vector<8x8xf32>
    %27 = tpu.matmul %24, %26, %cst_23 {dimension_numbers = #tpu.dot_dimension_numbers<[1], [0], [0], [1], [0, 0, 1, 1], [], []>} : vector<8x8xbf16>, vector<8x8xbf16>, vector<8x8xf32> -> vector<8x8xf32>
    %28 = vector.broadcast %23 : vector<8x1xf32> to vector<8x8xf32>
    %29 = arith.mulf %27, %28 : vector<8x8xf32>
    %30 = arith.truncf %29 : vector<8x8xf32> to vector<8x8xbf16>
    %c0_24 = arith.constant 0 : index
    %c0_25 = arith.constant 0 : index
    %31 = vector.load %arg12[%c0_24, %c0_25] : memref<8x32xbf16, #tpu.memory_space<vmem>>, vector<8x8xbf16>
    tpu.vector_store %arg12[%c0_24, %c0_25], %30 {strides = array<i32>} : memref<8x32xbf16, #tpu.memory_space<vmem>>, vector<8x8xbf16>,
    %c0_26 = arith.constant 0 : index
    %c8 = arith.constant 8 : index
    %32 = vector.load %arg11[%c0_26, %c8] : memref<8x32xbf16, #tpu.memory_space<vmem>>, vector<8x8xbf16>
    %c0_27 = arith.constant 0 : index
    %c1 = arith.constant 1 : index
    %c0_28 = arith.constant 0 : index
    %c0_29 = arith.constant 0 : index
    %33 = vector.load %arg3[%c0_27, %c1, %c0_28, %c0_29] : memref<1x4x8x8xbf16, #tpu.memory_space<vmem>>, vector<1x1x8x8xbf16>
    %34 = vector.shape_cast %33 : vector<1x1x8x8xbf16> to vector<8x8xbf16>
    %cst_30 = arith.constant dense<0.000000e+00> : vector<8x8xf32>
    %35 = tpu.matmul %32, %34, %cst_30 {dimension_numbers = #tpu.dot_dimension_numbers<[1], [0], [0], [1], [0, 0, 1, 1], [], []>} : vector<8x8xbf16>, vector<8x8xbf16>, vector<8x8xf32> -> vector<8x8xf32>
    %36 = arith.addf %35, %10 : vector<8x8xf32>
    %cst_31 = arith.constant dense<0xFF800000> : vector<8xf32>
    %37 = vector.multi_reduction <maximumf>, %36, %cst_31 [1] : vector<8x8xf32> to vector<8xf32>
    %38 = vector.shape_cast %37 : vector<8xf32> to vector<8x1xf32>
    %39 = vector.broadcast %38 : vector<8x1xf32> to vector<8x8xf32>
    %40 = arith.subf %36, %39 : vector<8x8xf32>
    %41 = math.exp %40 : vector<8x8xf32>
    %cst_32 = arith.constant dense<0.000000e+00> : vector<8xf32>
    %42 = vector.multi_reduction <add>, %41, %cst_32 [1] : vector<8x8xf32> to vector<8xf32>
    %43 = vector.shape_cast %42 : vector<8xf32> to vector<8x1xf32>
    %44 = tpu.reciprocal %43 {approx = true} : vector<8x1xf32> -> vector<8x1xf32>
    %45 = arith.truncf %41 : vector<8x8xf32> to vector<8x8xbf16>
    %c0_33 = arith.constant 0 : index
    %c1_34 = arith.constant 1 : index
    %c0_35 = arith.constant 0 : index
    %c0_36 = arith.constant 0 : index
    %46 = vector.load %arg4[%c0_33, %c1_34, %c0_35, %c0_36] : memref<1x4x8x8xbf16, #tpu.memory_space<vmem>>, vector<1x1x8x8xbf16>
    %47 = vector.shape_cast %46 : vector<1x1x8x8xbf16> to vector<8x8xbf16>
    %cst_37 = arith.constant dense<0.000000e+00> : vector<8x8xf32>
    %48 = tpu.matmul %45, %47, %cst_37 {dimension_numbers = #tpu.dot_dimension_numbers<[1], [0], [0], [1], [0, 0, 1, 1], [], []>} : vector<8x8xbf16>, vector<8x8xbf16>, vector<8x8xf32> -> vector<8x8xf32>
    %49 = vector.broadcast %44 : vector<8x1xf32> to vector<8x8xf32>
    %50 = arith.mulf %48, %49 : vector<8x8xf32>
    %51 = arith.truncf %50 : vector<8x8xf32> to vector<8x8xbf16>
    %c0_38 = arith.constant 0 : index
    %c8_39 = arith.constant 8 : index
    %52 = vector.load %arg12[%c0_38, %c8_39] : memref<8x32xbf16, #tpu.memory_space<vmem>>, vector<8x8xbf16>
    tpu.vector_store %arg12[%c0_38, %c8_39], %51 {strides = array<i32>} : memref<8x32xbf16, #tpu.memory_space<vmem>>, vector<8x8xbf16>,
    %c0_40 = arith.constant 0 : index
    %c16 = arith.constant 16 : index
    %53 = vector.load %arg11[%c0_40, %c16] : memref<8x32xbf16, #tpu.memory_space<vmem>>, vector<8x8xbf16>
    %c0_41 = arith.constant 0 : index
    %c2 = arith.constant 2 : index
    %c0_42 = arith.constant 0 : index
    %c0_43 = arith.constant 0 : index
    %54 = vector.load %arg3[%c0_41, %c2, %c0_42, %c0_43] : memref<1x4x8x8xbf16, #tpu.memory_space<vmem>>, vector<1x1x8x8xbf16>
    %55 = vector.shape_cast %54 : vector<1x1x8x8xbf16> to vector<8x8xbf16>
    %cst_44 = arith.constant dense<0.000000e+00> : vector<8x8xf32>
    %56 = tpu.matmul %53, %55, %cst_44 {dimension_numbers = #tpu.dot_dimension_numbers<[1], [0], [0], [1], [0, 0, 1, 1], [], []>} : vector<8x8xbf16>, vector<8x8xbf16>, vector<8x8xf32> -> vector<8x8xf32>
    %57 = arith.addf %56, %10 : vector<8x8xf32>
    %cst_45 = arith.constant dense<0xFF800000> : vector<8xf32>
    %58 = vector.multi_reduction <maximumf>, %57, %cst_45 [1] : vector<8x8xf32> to vector<8xf32>
    %59 = vector.shape_cast %58 : vector<8xf32> to vector<8x1xf32>
    %60 = vector.broadcast %59 : vector<8x1xf32> to vector<8x8xf32>
    %61 = arith.subf %57, %60 : vector<8x8xf32>
    %62 = math.exp %61 : vector<8x8xf32>
    %cst_46 = arith.constant dense<0.000000e+00> : vector<8xf32>
    %63 = vector.multi_reduction <add>, %62, %cst_46 [1] : vector<8x8xf32> to vector<8xf32>
    %64 = vector.shape_cast %63 : vector<8xf32> to vector<8x1xf32>
    %65 = tpu.reciprocal %64 {approx = true} : vector<8x1xf32> -> vector<8x1xf32>
    %66 = arith.truncf %62 : vector<8x8xf32> to vector<8x8xbf16>
    %c0_47 = arith.constant 0 : index
    %c2_48 = arith.constant 2 : index
    %c0_49 = arith.constant 0 : index
    %c0_50 = arith.constant 0 : index
    %67 = vector.load %arg4[%c0_47, %c2_48, %c0_49, %c0_50] : memref<1x4x8x8xbf16, #tpu.memory_space<vmem>>, vector<1x1x8x8xbf16>
    %68 = vector.shape_cast %67 : vector<1x1x8x8xbf16> to vector<8x8xbf16>
    %cst_51 = arith.constant dense<0.000000e+00> : vector<8x8xf32>
    %69 = tpu.matmul %66, %68, %cst_51 {dimension_numbers = #tpu.dot_dimension_numbers<[1], [0], [0], [1], [0, 0, 1, 1], [], []>} : vector<8x8xbf16>, vector<8x8xbf16>, vector<8x8xf32> -> vector<8x8xf32>
    %70 = vector.broadcast %65 : vector<8x1xf32> to vector<8x8xf32>
    %71 = arith.mulf %69, %70 : vector<8x8xf32>
    %72 = arith.truncf %71 : vector<8x8xf32> to vector<8x8xbf16>
    %c0_52 = arith.constant 0 : index
    %c16_53 = arith.constant 16 : index
    %73 = vector.load %arg12[%c0_52, %c16_53] : memref<8x32xbf16, #tpu.memory_space<vmem>>, vector<8x8xbf16>
    tpu.vector_store %arg12[%c0_52, %c16_53], %72 {strides = array<i32>} : memref<8x32xbf16, #tpu.memory_space<vmem>>, vector<8x8xbf16>,
    %c0_54 = arith.constant 0 : index
    %c24 = arith.constant 24 : index
    %74 = vector.load %arg11[%c0_54, %c24] : memref<8x32xbf16, #tpu.memory_space<vmem>>, vector<8x8xbf16>
    %c0_55 = arith.constant 0 : index
    %c3 = arith.constant 3 : index
    %c0_56 = arith.constant 0 : index
    %c0_57 = arith.constant 0 : index
    %75 = vector.load %arg3[%c0_55, %c3, %c0_56, %c0_57] : memref<1x4x8x8xbf16, #tpu.memory_space<vmem>>, vector<1x1x8x8xbf16>
    %76 = vector.shape_cast %75 : vector<1x1x8x8xbf16> to vector<8x8xbf16>
    %cst_58 = arith.constant dense<0.000000e+00> : vector<8x8xf32>
    %77 = tpu.matmul %74, %76, %cst_58 {dimension_numbers = #tpu.dot_dimension_numbers<[1], [0], [0], [1], [0, 0, 1, 1], [], []>} : vector<8x8xbf16>, vector<8x8xbf16>, vector<8x8xf32> -> vector<8x8xf32>
    %78 = arith.addf %77, %10 : vector<8x8xf32>
    %cst_59 = arith.constant dense<0xFF800000> : vector<8xf32>
    %79 = vector.multi_reduction <maximumf>, %78, %cst_59 [1] : vector<8x8xf32> to vector<8xf32>
    %80 = vector.shape_cast %79 : vector<8xf32> to vector<8x1xf32>
    %81 = vector.broadcast %80 : vector<8x1xf32> to vector<8x8xf32>
    %82 = arith.subf %78, %81 : vector<8x8xf32>
    %83 = math.exp %82 : vector<8x8xf32>
    %cst_60 = arith.constant dense<0.000000e+00> : vector<8xf32>
    %84 = vector.multi_reduction <add>, %83, %cst_60 [1] : vector<8x8xf32> to vector<8xf32>
    %85 = vector.shape_cast %84 : vector<8xf32> to vector<8x1xf32>
    %86 = tpu.reciprocal %85 {approx = true} : vector<8x1xf32> -> vector<8x1xf32>
    %87 = arith.truncf %83 : vector<8x8xf32> to vector<8x8xbf16>
    %c0_61 = arith.constant 0 : index
    %c3_62 = arith.constant 3 : index
    %c0_63 = arith.constant 0 : index
    %c0_64 = arith.constant 0 : index
    %88 = vector.load %arg4[%c0_61, %c3_62, %c0_63, %c0_64] : memref<1x4x8x8xbf16, #tpu.memory_space<vmem>>, vector<1x1x8x8xbf16>
    %89 = vector.shape_cast %88 : vector<1x1x8x8xbf16> to vector<8x8xbf16>
    %cst_65 = arith.constant dense<0.000000e+00> : vector<8x8xf32>
    %90 = tpu.matmul %87, %89, %cst_65 {dimension_numbers = #tpu.dot_dimension_numbers<[1], [0], [0], [1], [0, 0, 1, 1], [], []>} : vector<8x8xbf16>, vector<8x8xbf16>, vector<8x8xf32> -> vector<8x8xf32>
    %91 = vector.broadcast %86 : vector<8x1xf32> to vector<8x8xf32>
    %92 = arith.mulf %90, %91 : vector<8x8xf32>
    %93 = arith.truncf %92 : vector<8x8xf32> to vector<8x8xbf16>
    %c0_66 = arith.constant 0 : index
    %c24_67 = arith.constant 24 : index
    %94 = vector.load %arg12[%c0_66, %c24_67] : memref<8x32xbf16, #tpu.memory_space<vmem>>, vector<8x8xbf16>
    tpu.vector_store %arg12[%c0_66, %c24_67], %93 {strides = array<i32>} : memref<8x32xbf16, #tpu.memory_space<vmem>>, vector<8x8xbf16>,
    %c0_68 = arith.constant 0 : index
    %c0_69 = arith.constant 0 : index
    %95 = vector.load %arg12[%c0_68, %c0_69] : memref<8x32xbf16, #tpu.memory_space<vmem>>, vector<8x32xbf16>
    %c0_70 = arith.constant 0 : index
    %c0_71 = arith.constant 0 : index
    %96 = vector.load %arg8[%c0_70, %c0_71] : memref<32x32xbf16, #tpu.memory_space<vmem>>, vector<32x32xbf16>
    %cst_72 = arith.constant dense<0.000000e+00> : vector<8x32xf32>
    %97 = tpu.matmul %95, %96, %cst_72 {dimension_numbers = #tpu.dot_dimension_numbers<[1], [0], [0], [1], [0, 0, 1, 1], [], []>} : vector<8x32xbf16>, vector<32x32xbf16>, vector<8x32xf32> -> vector<8x32xf32>
    %c0_73 = arith.constant 0 : index
    %c0_74 = arith.constant 0 : index
    %98 = vector.load %arg9[%c0_73, %c0_74] : memref<1x32xf32, #tpu.memory_space<vmem>>, vector<1x32xf32>
    %99 = vector.broadcast %98 : vector<1x32xf32> to vector<8x32xf32>
    %100 = arith.addf %97, %99 : vector<8x32xf32>
    %c0_75 = arith.constant 0 : index
    %c0_76 = arith.constant 0 : index
    %c0_77 = arith.constant 0 : index
    %101 = vector.load %arg10[%c0_75, %c0_76, %c0_77] : memref<1x8x32xf32, #tpu.memory_space<vmem>>, vector<1x8x32xf32>
    %102 = vector.shape_cast %101 : vector<1x8x32xf32> to vector<8x32xf32>
    %103 = vector.shape_cast %100 : vector<8x32xf32> to vector<1x8x32xf32>
    tpu.vector_store %arg10[%c0_75, %c0_76, %c0_77], %103 {strides = array<i32>} : memref<1x8x32xf32, #tpu.memory_space<vmem>>, vector<1x8x32xf32>,
    return
  }
  func.func @transform_0(%arg0: i32, %arg1: i32) -> (i32, i32, i32) {
    %c0_i32 = arith.constant 0 : i32
    %c0_i32_0 = arith.constant 0 : i32
    return %arg0, %arg1, %c0_i32 : i32, i32, i32
  }
  func.func @transform_1(%arg0: i32, %arg1: i32) -> (i32, i32, i32, i32) {
    %c0_i32 = arith.constant 0 : i32
    %c0_i32_0 = arith.constant 0 : i32
    %c0_i32_1 = arith.constant 0 : i32
    %c0_i32_2 = arith.constant 0 : i32
    return %arg0, %c0_i32, %c0_i32_0, %c0_i32_1 : i32, i32, i32, i32
  }
  func.func @transform_2(%arg0: i32, %arg1: i32) -> (i32, i32, i32, i32) {
    %c0_i32 = arith.constant 0 : i32
    %c0_i32_0 = arith.constant 0 : i32
    %c0_i32_1 = arith.constant 0 : i32
    %c0_i32_2 = arith.constant 0 : i32
    return %arg0, %c0_i32, %c0_i32_0, %c0_i32_1 : i32, i32, i32, i32
  }
  func.func @transform_3(%arg0: i32, %arg1: i32) -> (i32, i32) {
    %c0_i32 = arith.constant 0 : i32
    %c0_i32_0 = arith.constant 0 : i32
    return %arg1, %c0_i32 : i32, i32
  }
  func.func @transform_4(%arg0: i32, %arg1: i32) -> (i32, i32) {
    %c0_i32 = arith.constant 0 : i32
    %c0_i32_0 = arith.constant 0 : i32
    %c0_i32_1 = arith.constant 0 : i32
    return %c0_i32, %c0_i32_0 : i32, i32
  }
  func.func @transform_5(%arg0: i32, %arg1: i32) -> (i32, i32) {
    %c0_i32 = arith.constant 0 : i32
    %c0_i32_0 = arith.constant 0 : i32
    %c0_i32_1 = arith.constant 0 : i32
    return %c0_i32, %c0_i32_0 : i32, i32
  }
  func.func @transform_6(%arg0: i32, %arg1: i32) -> (i32, i32) {
    %c0_i32 = arith.constant 0 : i32
    %c0_i32_0 = arith.constant 0 : i32
    %c0_i32_1 = arith.constant 0 : i32
    return %c0_i32, %c0_i32_0 : i32, i32
  }
  func.func @transform_7(%arg0: i32, %arg1: i32) -> (i32, i32) {
    %c0_i32 = arith.constant 0 : i32
    %c0_i32_0 = arith.constant 0 : i32
    %c0_i32_1 = arith.constant 0 : i32
    return %c0_i32, %c0_i32_0 : i32, i32
  }
  func.func @transform_8(%arg0: i32, %arg1: i32) -> (i32, i32, i32) {
    %c0_i32 = arith.constant 0 : i32
    %c0_i32_0 = arith.constant 0 : i32
    return %arg0, %arg1, %c0_i32 : i32, i32, i32
  }
}

</mosaic_0001>

<bundles_post_ra>
// kernel: tpu_custom_call.1
= control target key start
LH: loop header
LB: loop body
LE: loop exit
PB: predicated region body
PF: predicated region fallthrough
CT: control target
= control target key end

     0   :  { %s2146_s0 = inlined_call_operand.hbm [shape: bf16[2,8,32], index: 0, kind: input, shape index: {}]   ;;  %s2147_s1 = inlined_call_operand.hbm [shape: bf16[2,4,8,8], index: 1, kind: input, shape index: {}]   ;;  %s2148_s2 = inlined_call_operand.hbm [shape: bf16[2,4,8,8], index: 2, kind: input, shape index: {}]   ;;  %s2149_s3 = inlined_call_operand.vmem [shape: bf16[8,8], index: 3, kind: input, shape index: {}]   ;;  %s2150_s4 = inlined_call_operand.hbm [shape: bf16[32,32], index: 4, kind: input, shape index: {}]   ;;  %s2151_s5 = inlined_call_operand.vmem [shape: f32[1,32], index: 5, kind: input, shape index: {}]   ;;  %s2152_s6 = inlined_call_operand.hbm [shape: bf16[32,32], index: 6, kind: input, shape index: {}]   ;;  %s2153_s7 = inlined_call_operand.vmem [shape: f32[1,32], index: 7, kind: input, shape index: {}]   ;;  %s2154_s8 = inlined_call_operand.hbm [shape: f32[2,8,32], index: 8, kind: output, shape index: {}]  }
   0x1   :  { %2166 = sst [smem:[#allocation23_spill]] %s2147_s1 }
   0x2   :  { %2167 = sst [smem:[#allocation24_spill]] %s2148_s2 }
   0x3   :  { %2168 = sst [smem:[#allocation25_spill]] %s2150_s4 }
   0x4   :  { %2169 = sst [smem:[#allocation26_spill]] %s2153_s7 }
   0x5   :  { %2170 = sst [smem:[#allocation27_spill]] %s2154_s8 }
   0x6   :  { %13 = vsyncpa [#allocation5], 0 }
   0x7   :  { %15 = vsyncpa [#allocation5 + $0x1], 0 }
   0x8   :  { %16 = vsyncpa [#allocation8], 0 }
   0x9   :  { %18 = vsyncpa [#allocation8 + $0x1], 0 }
   0xa   :  { %19 = vsyncpa [#allocation11], 0 }
   0xb   :  { %20 = vsyncpa [#allocation6], 0 }
   0xc   :  { %22 = vsyncpa [#allocation6 + $0x1], 0  ;;  %s1814_s27 = smov 0   ;;  %s1816_s28 = smov 0  }
   0xd   :  { %s1818_s29 = smov 0   ;;  %s1820_s30 = smov 0  }
   0xe   :  { %s1822_s9 = smov 0   ;;  %s1824_s10 = smov 0  }
   0xf LB: > { %2171 = sst [smem:[#allocation18_spill]] %s1731_s27  ;;  %s1845_s11 = sadd.s32 4294967295, %s1751_s10   ;;  %s1751_s10 = sphi %s1824_s10, %s28_s10   ;;  %s1747_s9 = sphi %s1822_s9, %s2206_s9   ;;  %s1743_s30 = sphi %s1820_s30, %s2205_s30   ;;  %s1739_s29 = sphi %s1818_s29, %s2204_s29   ;;  %s1735_s28 = sphi %s1816_s28, %s2203_s28   ;;  %s1731_s27 = sphi %s1814_s27, %s2202_s27  }
  0x10   : > { %s1257_s12 = sadd.s32 4294967294, %s1751_s10   ;;  %p56_p0 = scmp.ne.s32.totalorder %s1739_s29, %s1735_s28 }
  0x11   : > { %p57_p1 = scmp.eq.s32.totalorder %s1751_s10, 0  ;;  %p62_p2 = scmp.ne.s32.totalorder %s1735_s28, %s1731_s27 }
  0x12   : > { %p2155_p3 = scmp.eq.s32.totalorder %s1845_s11, 0  ;;  %p250_p4 = scmp.eq.s32.totalorder %s1845_s11, 1 }
  0x13   : > { %p1856_p5 = por %p57_p1, %p56_p0  ;;  %p256_p6 = scmp.eq.s32.totalorder %s1257_s12, 1 }
  0x14   : > { %p1862_p7 = por %p2155_p3, %p62_p2  ;;  %p1866_p8 = por %p250_p4, %p56_p0 }
  0x15   : > { %p1870_p9 = por %p256_p6, %p62_p2  ;;  %p1258_p10 = scmp.ge.s32.totalorder %s1751_s10, 1 }
  0x16   : > { %s2174_s16 = scalar_select %p1866_p8, 1, 0 }
  0x17   : > { %s2176_s17 = scalar_select %p1870_p9, 1, 0 }
  0x18   : > { %2175 = sst [smem:[#allocation19_spill]] %s2174_s16  ;;  %p263_p11 = scmp.lt.s32.totalorder %s1751_s10, 3 }
  0x19   : > { %2177 = sst [smem:[#allocation20_spill]] %s2176_s17  ;;  %s1753_s19 = smov [#allocation10]  }
  0x1a   : > { %p1876_p12 = pnand %p1258_p10, %p263_p11  ;;  %s282_s20 = sshll.u32 %s1753_s19, 4  ;;  %s283_s20 = int_to_ptr.vmem [resolvable:$true] %s282_s20 }
  0x1b   : > { %s40_s22 = sadd.s32 1, %s1747_s9  ;;  %s1892_s23 = sand.u32 1, %s1739_s29  }
  0x1c   : > { %p1417_p13 = pneg %p1876_p12  ;;  %p1894_p2 = scmp.ge.s32.totalorder %s40_s22, 2 }
  0x1d   : > { %s1538_s25 = scalar_lea.vmem %s283_s20, 256  ;;  %p1546_p0 = scmp.lt.s32.totalorder %s283_s20, %s283_s20 }
  0x1e   : > { %p1886_p4 = pnand %p1417_p13, %p2155_p3  ;;  %p1539_p10 = scmp.ne.s32.totalorder %s283_s20, %s1538_s25 }
  0x1f   : > { %p1547_p3 = scmp.lt.s32.totalorder %s1538_s25, %s1538_s25 }
  0x20   : > { %p1529_p6 = pneg %p1886_p4 }
  0x21   : > { %p1548_p1 = por %p1547_p3, %p1546_p0 }
  0x22   : > { %p1541_p11 = pnand %p1539_p10, %p1529_p6 }
  0x24   : > { %p1542_p13 = pneg %p1541_p11 }
  0x26   : > { %p1549_p9 = pnand %p1548_p1, %p1542_p13 }
  0x28   : > { %1552 = shalt.err (!%p1549_p9)
}
  0x29   : > { %s2161_s26 = smov 64   ;;  %s2163_s12 = smov 4  }
  0x2a   : > { %s2181_s4 = sld [smem:[#allocation25_spill]]  ;;  %s2208_s22 = smov (%p1894_p2, %s40_s22), 0 }
  0x2b   : > { %2182 = sst [smem:[#allocation21_spill]] %s2208_s22  ;;  %p2183_p3 = scmp.lt.s32.totalorder %s1751_s10, 2 }
  0x2c   : > { %s334_s17 = sand.u32 1, %s1751_s10   ;;  %s44_s27 = ssub.s32 %s1747_s9, %s2208_s22 }
  0x2d   : > { %p1919_p9 = pnand %p2183_p3, %p1856_p5  ;;  %p47_p0 = scmp.eq.s32.totalorder %s44_s27, 0 }
  0x2e   : > { %s1265_s8 = sshll.u32 %s1892_s23, 4  ;;  %s1310_s7 = sshll.u32 %s1747_s9, 8 }
  0x2f   : > { %s2185_s16 = sadd.s32 1, %s1739_s29  ;;  %s2187_s1 = sld [smem:[#allocation23_spill]] }
  0x30   : > { %1420 = dma.hbm_to_vmem [thread:$0]  (!%p1886_p4), %s2181_s4, 256, %s283_s20, [#allocation11], %s2161_s26, %s2161_s26, %s2163_s12  }
  0x31   : > { %s1931_s19 = scalar_select %p47_p0, %s1739_s29, %s2185_s16  }
  0x32   : > { %s338_s25 = scalar_lea.vmem [#allocation7], %s1265_s8  ;;  %s1936_s12 = scalar_lea.sflag [#allocation8], %s334_s17 }
  0x33   : > { %2186 = sst [smem:[#allocation22_spill]] %s1931_s19  ;;  %s345_s26 = sshll.u32 %s338_s25, 4  ;;  %s346_s26 = int_to_ptr.vmem [resolvable:$true] %s345_s26 }
  0x34   : > { %p1555_p5 = pneg %p1919_p9  ;;  %s1566_s4 = scalar_lea.vmem %s346_s26, 256 }
  0x35   : > { %s344_s14 = scalar_lea.hbm %s2187_s1, %s1310_s7  ;;  %p1567_p1 = scmp.ne.s32.totalorder %s346_s26, %s1566_s4 }
  0x36   : > { %s1756_s27 = smov [#allocation7]  }
  0x37   : > { %p1569_p2 = pnand %p1567_p1, %p1555_p5  ;;  %s1571_s16 = sshll.u32 %s1756_s27, 4  ;;  %s1572_s16 = int_to_ptr.vmem [resolvable:$false] %s1571_s16 }
  0x38   : > { %s1573_s22 = scalar_lea.vmem %s1572_s16, 512  ;;  %p1574_p11 = scmp.lt.s32.totalorder %s346_s26, %s1572_s16 }
  0x39   : > { %p1570_p10 = pneg %p1569_p2  ;;  %p1575_p13 = scmp.lt.s32.totalorder %s1573_s22, %s1566_s4 }
  0x3b   : > { %p1576_p3 = por %p1575_p13, %p1574_p11 }
  0x3d   : > { %p1577_p0 = pnand %p1576_p3, %p1570_p10 }
  0x3f   : > { %1580 = shalt.err (!%p1577_p0)
}
  0x40   : > { %s2188_s17 = smov 4   ;;  %s2189_s20 = smov 64  }
  0x41   : > { %1430 = dma.hbm_to_vmem [thread:$0]  (!%p1919_p9), %s344_s14, 256, %s346_s26, %s1936_s12, %s2189_s20, %s2189_s20, %s2188_s17  }
  0x42   : > { %s2190_s2 = sld [smem:[#allocation24_spill]]  ;;  %s359_s27 = scalar_lea.vmem [#allocation9], %s1265_s8 }
  0x43   : > { %s366_s19 = sshll.u32 %s359_s27, 4  ;;  %s1757_s16 = smov [#allocation12]   ;;  %s1970_s19 = int_to_ptr.vmem [resolvable:$true] %s366_s19 }
  0x44   : > { %s298_s4 = sshll.u32 %s1757_s16, 4  ;;  %s299_s4 = int_to_ptr.vmem [resolvable:$true] %s298_s4 }
  0x45   : > { %s1592_s22 = scalar_lea.vmem %s299_s4, 256  ;;  %p1600_p11 = scmp.lt.s32.totalorder %s299_s4, %s299_s4 }
  0x46   : > { %p1593_p1 = scmp.ne.s32.totalorder %s299_s4, %s1592_s22  ;;  %p1601_p13 = scmp.lt.s32.totalorder %s1592_s22, %s1592_s22 }
  0x48   : > { %s1952_s1 = scalar_lea.hbm %s2190_s2, %s1310_s7  ;;  %p1595_p2 = pnand %p1593_p1, %p1529_p6 }
  0x49   : > { %p1602_p3 = por %p1601_p13, %p1600_p11 }
  0x4a   : > { %p1596_p10 = pneg %p1595_p2 }
  0x4c   : > { %p1603_p0 = pnand %p1602_p3, %p1596_p10 }
  0x4e   : > { %1606 = shalt.err (!%p1603_p0)
}
  0x4f   : > { %1423 = dma.hbm_to_vmem [thread:$0]  (!%p1886_p4), %s2152_s6, 256, %s299_s4, [#allocation11], %s2189_s20, %s2189_s20, %s2188_s17  }
  0x50   : > { %s1263_s26 = sshll.u32 %s1892_s23, 2  ;;  %s1264_s14 = sshll.u32 %s1747_s9, 6 }
  0x51   : > { %s325_s27 = scalar_lea.hbm %s2146_s0, %s1264_s14  ;;  %s319_s21 = scalar_lea.vmem [#allocation4], %s1263_s26 }
  0x52   : > { %s327_s16 = sshll.u32 %s319_s21, 4  ;;  %s316_s22 = scalar_lea.sflag [#allocation5], %s1892_s23  ;;  %s328_s16 = int_to_ptr.vmem [resolvable:$true] %s327_s16 }
  0x53   : > { %s1620_s2 = scalar_lea.vmem %s328_s16, 64  ;;  %s1758_s7 = smov [#allocation4]  }
  0x54   : > { %p1621_p6 = scmp.ne.s32.totalorder %s328_s16, %s1620_s2  ;;  %s1625_s4 = sshll.u32 %s1758_s7, 4  ;;  %s1626_s4 = int_to_ptr.vmem [resolvable:$false] %s1625_s4 }
  0x55   : > { %s1627_s8 = scalar_lea.vmem %s1626_s4, 128  ;;  %p1628_p4 = scmp.lt.s32.totalorder %s328_s16, %s1626_s4 }
  0x56   : > { %p1623_p1 = pnand %p1621_p6, %p1555_p5  ;;  %p1629_p10 = scmp.lt.s32.totalorder %s1627_s8, %s1620_s2 }
  0x58   : > { %p1624_p2 = pneg %p1623_p1  ;;  %p1630_p11 = por %p1629_p10, %p1628_p4 }
  0x5a   : > { %p1631_p13 = pnand %p1630_p11, %p1624_p2 }
  0x5c   : > { %1634 = shalt.err (!%p1631_p13)
}
  0x5d   : > { %1427 = dma.hbm_to_vmem [thread:$0]  (!%p1919_p9), %s325_s27, 64, %s328_s16, %s316_s22  }
  0x5e   : > { %s1648_s23 = scalar_lea.vmem %s1970_s19, 256  ;;  %s1759_s26 = smov [#allocation9]  }
  0x5f   : > { %p1649_p3 = scmp.ne.s32.totalorder %s1970_s19, %s1648_s23  ;;  %s1653_s14 = sshll.u32 %s1759_s26, 4  ;;  %s1654_s14 = int_to_ptr.vmem [resolvable:$false] %s1653_s14 }
  0x60   : > { %s1655_s2 = scalar_lea.vmem %s1654_s14, 512  ;;  %p1656_p1 = scmp.lt.s32.totalorder %s1970_s19, %s1654_s14 }
  0x61   : > { %p1651_p0 = pnand %p1649_p3, %p1555_p5  ;;  %p1657_p2 = scmp.lt.s32.totalorder %s1655_s2, %s1648_s23 }
  0x63   : > { %p1652_p6 = pneg %p1651_p0  ;;  %p1658_p4 = por %p1657_p2, %p1656_p1 }
  0x65   : > { %p1659_p10 = pnand %p1658_p4, %p1652_p6 }
  0x67   : > { %1662 = shalt.err (!%p1659_p10)
}
  0x68   : > { %1433 = dma.hbm_to_vmem [thread:$0]  (!%p1919_p9), %s1952_s1, 256, %s1970_s19, %s1936_s12, %s2189_s20, %s2189_s20, %s2188_s17  }
  0x69   : > { %378 = sbr.rel (%p1876_p12) target bundleno = 1348 (0x544), region = 52  ;;  %s1995_s24 = sand.u32 (!%p1876_p12), 1, %s1735_s28  }
  0x6a   : > { %s1272_s25 = sshll.u32 (!%p1876_p12), %s1995_s24, 2  ;;  %s381_s27 = scalar_lea.sflag (!%p1876_p12), [#allocation5], %s1995_s24 }
  0x6b   : > { %s384_s21 = scalar_lea.vmem (!%p1876_p12), [#allocation4], %s1272_s25 }
  0x6e   : > { %1714 = dma.done.wait (%p1862_p7), %s381_s27, 64  }
  0x6f   : > { %1716 = vsyncadd (%p1862_p7), %s381_s27, 4294967232  ;;  %s389_s1 = sand.u32 1, %s1845_s11   ;;  %s1273_s13 = sshll.u32 %s1995_s24, 4 }
  0x70   : > { %s390_s18 = scalar_lea.sflag [#allocation8], %s389_s1  ;;  %s2005_s12 = scalar_lea.vmem [#allocation7], %s1273_s13 }
  0x71   : > { %1718 = dma.done.wait (%p1862_p7), %s390_s18, 512  }
  0x72   : > { %1720 = vsyncadd (%p1862_p7), %s390_s18, 4294966784  ;;  %s2011_s19 = scalar_lea.vmem [#allocation9], %s1273_s13  ;;  %p2191_p12 = scmp.eq.s32.totalorder %s1845_s11, 0 }
  0x74   : > { %1722 = dma.done.wait (%p2191_p12), [#allocation11], 512   ;;  %p2192_p9 = pmov %p2191_p12 }
  0x75   : > { %v1760_v0 = vmov 0.0   ;;  %vm1761_vm0 = vmmov 0   ;;  %v1504_v1 = vld [vmem:[#allocation10 + $0x8] sm:$0xff]   ;;  %v1505_v2 = vld [vmem:[#allocation10] sm:$0xff]   ;;  %v462_v3 = vld [vmem:[%s384_s21] sm:$0xf] }
  0x76   : > { %1724 = vsyncadd (%p2192_p9), [#allocation11], 4294966784  ;;  %1337 = vmatprep.subr.bf16.mxu0 %v1760_v0  ;;  %1341 = vmatprep.mubr.msk.bf16.mxu0 %vm1761_vm0, %v1760_v0  ;;  %vm486_vm1 = vcmask 261120   ;;  %v536_v4 = vld [vmem:[%s2005_s12] sm:$0xf]  ;;  %vm541_vm2 = vcmask 1043456  }
  0x77   : > { %1345 = vmatprep.subr.bf16.mxu1 %v1760_v0  ;;  %1347 = vmatprep.mubr.msk.bf16.mxu1 %vm1761_vm0, %v1760_v0  ;;  %v543_v5 = vsel %vm541_vm2, %v536_v4, 0  ;;  %v1284_v6 = vld [vmem:[%s2005_s12 + $0x4] sm:$0xf]  ;;  %v1278_v8 = vld [vmem:[%s2151_s5] ss:$0 sm:$0xff]  ;;  %vm531_vm3 = vcmask 257024  }
  0x78   : > { %1338 = vmatpush3.bf16.msra.mxu0 %v1504_v1  ;;  %1346 = vmatpush3.bf16.msra.mxu1 %v543_v5  ;;  %v659_v7 = vsel %vm541_vm2, %v1284_v6, 0  ;;  %vm537_vm4 = vcmask 64512   ;;  %s1762_s17 = smov 104   ;;  %s1763_s20 = smov 120   ;;  %v1290_v19 = vld [vmem:[%s2005_s12 + $0x8] sm:$0xf] }
  0x79   : > { %1339 = vmatprep.subr.bf16.mxu0 %v1760_v0  ;;  %1351 = vmatprep.subr.bf16.mxu1 %v1760_v0  ;;  %s1764_s16 = smov 112   ;;  %v782_v20 = vsel %vm541_vm2, %v1290_v19, 0  ;;  %v1296_v22 = vld [vmem:[%s2005_s12 + $0xc] sm:$0xf]  ;;  %v533_v26 = vld [vmem:[%s2149_s3] sm:$0xf] }
  0x7a   : > { %v905_v23 = vsel %vm541_vm2, %v1296_v22, 0  ;;  %v534_v27 = vunpack.c.l.bf16 %v533_v26  ;;  %v596_v34 = vld [vmem:[%s2011_s19] sm:$0xf]  ;;  %v1287_v57 = vld [vmem:[%s2011_s19 + $0x4] sm:$0xf]  ;;  %vm645_vm5 = vcmask 60416  }
  0x7b   : > { %v601_v35 = vsel %vm541_vm2, %v596_v34, 0  ;;  %v718_v60 = vsel %vm541_vm2, %v1287_v57, 0  ;;  %v1293_v5 = vld [vmem:[%s2011_s19 + $0x8] sm:$0xf]  ;;  %s1765_s4 = smov 8   ;;  %s1766_s8 = smov 16  }
  0x7c   : > { %1340 = vmatpush3.bf16.msra.mxu0 %v1505_v2  ;;  %s1767_s23 = smov 24   ;;  %vm768_vm6 = vcmask 126016   ;;  %vm891_vm7 = vcmask 191616   ;;  %vm1014_vm8 = vcmask 257216   ;;  %s1277_s14 = sshll.u32 %s1995_s24, 3 }
  0x7d   : > { %1357 = vmatprep.subr.bf16.mxu0 %v1760_v0  ;;  %s2194_s27 = sld [smem:[#allocation26_spill]]  ;;  %s1307_s21 = sshll.u32 %s1743_s30, 7 }
  0x7e   : > { %s456_s1 = scalar_lea.vmem [#allocation13], %s1277_s14  ;;  %s1085_s15 = scalar_lea.sflag [#allocation6], %s1995_s24 }
  0x7f   : > { %1342 = vmatmul.mubr.msk.bf16.vlgmr.msra.gmra.mxu0 %vm486_vm1, %v462_v3  ;;  %s1099_s13 = sshll.u32 %s456_s1, 4  ;;  %s2099_s13 = int_to_ptr.vmem [resolvable:$true] %s1099_s13 }
  0x80   : > { %1359 = vmatprep.mubr.msk.bf16.mxu0 %vm1761_vm0, %v1760_v0  ;;  %1358 = vmatpush3.bf16.msra.mxu0 %v659_v7  ;;  %s1663_s30 = scalar_lea.vmem %s2099_s13, 128 }
  0x81   : > { %1369 = vmatprep.subr.bf16.mxu0 %v1760_v0  ;;  %p1664_p7 = scmp.ne.s32.totalorder %s2099_s13, %s1663_s30 }
  0x83   : > { %p1665_p5 = pnand %p1664_p7, %p1866_p8 }
  0x85   : > { %p1666_p11 = pneg %p1665_p5 }
 0x13f   : > { %v524_v9 = vpop.f32.mrf.mxu0 }
 0x140   : > { %v525_v10 = vadd.f32 %v1278_v8, %v524_v9 }
 0x141   : > { %v1343_v11 = vpop.f32.mrf.mxu0 }
 0x142   : > { %v530_v12 = vpack.c.bf16 %v525_v10, %v525_v10  ;;  %v841_v11 = vsel %vm541_vm2, %v1293_v5, 0 }
 0x143   : > { %v527_v13 = vpop.f32.mrf.mxu0 }
 0x144   : > { %532 = vst.msk [vmem:[#allocation2] sm:$0xf] %vm531_vm3, %v530_v12  ;;  %v1299_v12 = vld [vmem:[%s2011_s19 + $0xc] sm:$0xf]  ;;  %s2195_s19 = sld [smem:[#allocation27_spill]] }
 0x145   : > { %v1344_v14 = vpop.f32.mrf.mxu0 }
 0x14a   : > { %s2097_s11 = scalar_lea.hbm %s2195_s19, %s1307_s21 }
 0x14b   : > { %v535_v15 = vld [vmem:[#allocation2] sm:$0xf] }
 0x14c   : > { %v1506_v16 = vld [vmem:[#allocation2] ss:$0 sps:$4 sm:$0xff]   ;;  %1348 = vmatmul.mubr.msk.bf16.vlgmr.msra.gmra.mxu1 %vm537_vm4, %v535_v15 }
 0x14d   : > { %v1507_v17 = vld [vmem:[#allocation2] ss:$0 sps:$4 sm:$0xff]   ;;  %899 = vrot.lane.b32.xlu1 %v1506_v16, %s1762_s17  ;;  %1353 = vmatprep.mubr.msk.bf16.mxu1 %vm1761_vm0, %v1760_v0  ;;  %v964_v16 = vsel %vm541_vm2, %v1299_v12, 0  ;;  %s1768_s17 = smov [#allocation13]  }
 0x14e   : > { %653 = vrot.lane.b32.xlu0 %v1507_v17, %s1763_s20  ;;  %v1508_v18 = vld [vmem:[#allocation2] ss:$0 sps:$4 sm:$0xff]   ;;  %1352 = vmatpush3.bf16.msra.mxu1 %v601_v35  ;;  %s1667_s20 = sshll.u32 %s1768_s17, 4  ;;  %s1668_s20 = int_to_ptr.vmem [resolvable:$false] %s1667_s20 }
 0x14f   : > { %1363 = vmatprep.subr.bf16.mxu1 %v1760_v0  ;;  %p1670_p13 = scmp.lt.s32.totalorder %s2099_s13, %s1668_s20 }
 0x152   : > { %776 = vrot.lane.b32.xlu0 %v1508_v18, %s1764_s16  ;;  %s1669_s16 = scalar_lea.vmem %s1668_s20, 256 }
 0x153   : > { %p1671_p3 = scmp.lt.s32.totalorder %s1669_s16, %s1663_s30 }
 0x155   : > { %p1672_p0 = por %p1671_p3, %p1670_p13 }
 0x157   : > { %p1673_p6 = pnand %p1672_p0, %p1666_p11 }
 0x1bf   : > { %v900_v25 = vpop.permute.xlu1 %899 }
 0x1c0   : > { %v654_v21 = vpop.permute.xlu0 %653 }
 0x1c1   : > { %1360 = vmatmul.mubr.msk.bf16.vlgmr.msra.gmra.mxu0 %vm537_vm4, %v654_v21 }
 0x1c2   : > { %1370 = vmatpush3.bf16.msra.mxu0 %v782_v20  ;;  %1371 = vmatprep.mubr.msk.bf16.mxu0 %vm1761_vm0, %v1760_v0 }
 0x1c3   : > { %1381 = vmatprep.subr.bf16.mxu0 %v1760_v0 }
 0x1c4   : > { %v777_v24 = vpop.permute.xlu0 %776 }
 0x1c9   : > { %1372 = vmatmul.mubr.msk.bf16.vlgmr.msra.gmra.mxu0 %vm537_vm4, %v777_v24 }
 0x1ca   : > { %1382 = vmatpush3.bf16.msra.mxu0 %v905_v23  ;;  %1383 = vmatprep.mubr.msk.bf16.mxu0 %vm1761_vm0, %v1760_v0 }
 0x1cb   : > { %1393 = vmatprep.subr.bf16.mxu0 %v1760_v0 }
 0x1d1   : > { %1384 = vmatmul.mubr.msk.bf16.vlgmr.msra.gmra.mxu0 %vm537_vm4, %v900_v25 }
 0x1d2   : > { %1397 = vmatprep.mubr.msk.bf16.mxu0 %vm1761_vm0, %v1760_v0 }
 0x20c   : > { %v579_v28 = vpop.f32.mrf.mxu1 }
 0x20d   : > { %v580_v29 = vadd.f32 %v579_v28, %v534_v27 }
 0x20e   : > { %v1349_v30 = vpop.f32.mrf.mxu1 }
 0x20f   : > { %v585_v31 = vsel %vm537_vm4, %v580_v29, -inf }
 0x210   : > { %586 = vmax.xlane.f32.xlu1 %v585_v31  ;;  %v582_v32 = vpop.f32.mrf.mxu1 }
 0x212   : > { %v1350_v33 = vpop.f32.mrf.mxu1 }
 0x281   : > { %v695_v36 = vpop.f32.mrf.mxu0 }
 0x282   : > { %v696_v37 = vadd.f32 %v695_v36, %v534_v27 }
 0x283   : > { %v1361_v38 = vpop.f32.mrf.mxu0 }
 0x284   : > { %v701_v39 = vsel %vm537_vm4, %v696_v37, -inf }
 0x285   : > { %702 = vmax.xlane.f32.xlu0 %v701_v39  ;;  %v698_v40 = vpop.f32.mrf.mxu0 }
 0x287   : > { %v1362_v41 = vpop.f32.mrf.mxu0 }
 0x288   : > { %v1509_v41 = vld [vmem:[#allocation12 + $0x8] sm:$0xff]  }
 0x289   : > { %v818_v42 = vpop.f32.mrf.mxu0  ;;  %1394 = vmatpush3.bf16.msra.mxu0 %v1509_v41 }
 0x28a   : > { %v819_v43 = vadd.f32 %v818_v42, %v534_v27  ;;  %1395 = vmatprep.subr.bf16.mxu0 %v1760_v0 }
 0x28b   : > { %v1373_v44 = vpop.f32.mrf.mxu0 }
 0x28c   : > { %v824_v45 = vsel %vm537_vm4, %v819_v43, -inf  ;;  %v1510_v44 = vld [vmem:[#allocation12] sm:$0xff]  }
 0x28d   : > { %825 = vmax.xlane.f32.xlu0 %v824_v45  ;;  %v821_v46 = vpop.f32.mrf.mxu0  ;;  %1396 = vmatpush3.bf16.msra.mxu0 %v1510_v44 }
 0x28f   : > { %v1374_v47 = vpop.f32.mrf.mxu0 }
 0x291   : > { %v941_v48 = vpop.f32.mrf.mxu0 }
 0x292   : > { %v942_v49 = vadd.f32 %v941_v48, %v534_v27 }
 0x293   : > { %v1385_v50 = vpop.f32.mrf.mxu0 }
 0x294   : > { %v947_v51 = vsel %vm537_vm4, %v942_v49, -inf }
 0x295   : > { %948 = vmax.xlane.f32.xlu1 %v947_v51  ;;  %v944_v52 = vpop.f32.mrf.mxu0 }
 0x297   : > { %v1386_v53 = vpop.f32.mrf.mxu0 }
 0x299   : > { %v587_v54 = vpop.xlane.xlu1 %586 }
 0x29a   : > { %v588_v55 = vsub.f32 %v580_v29, %v587_v54 }
 0x29c   : > { %v589_v56 = vmul.f32 1.442695, %v588_v55 }
 0x29e   : > { %1511 = vpow2.f32 %v589_v56 }
 0x2ab   : > { %v1512_v58 = vpop.eup %1511 }
 0x2ac   : > { %v595_v59 = vpack.c.bf16 %v1512_v58, %v1512_v58  ;;  %v591_v17 = vsel %vm537_vm4, %v1512_v58, 0.0  ;;  %v1302_v58 = vld [vmem:[%s2194_s27] ss:$0 sm:$0xff] }
 0x2ae   : > { %1354 = vmatmul.mubr.msk.bf16.vlgmr.msra.gmra.mxu1 %vm537_vm4, %v595_v59 }
 0x2af   : > { %1364 = vmatpush3.bf16.msra.mxu1 %v718_v60  ;;  %1365 = vmatprep.mubr.msk.bf16.mxu1 %vm1761_vm0, %v1760_v0 }
 0x2b0   : > { %1375 = vmatprep.subr.bf16.mxu1 %v1760_v0 }
 0x30e   : > { %v703_v61 = vpop.xlane.xlu0 %702 }
 0x30f   : > { %v704_v62 = vsub.f32 %v696_v37, %v703_v61 }
 0x311   : > { %v705_v63 = vmul.f32 1.442695, %v704_v62 }
 0x313   : > { %1513 = vpow2.f32 %v705_v63 }
 0x316   : > { %v826_v1 = vpop.xlane.xlu0 %825 }
 0x317   : > { %v827_v2 = vsub.f32 %v819_v43, %v826_v1 }
 0x319   : > { %v828_v3 = vmul.f32 1.442695, %v827_v2 }
 0x31b   : > { %1515 = vpow2.f32 %v828_v3 }
 0x31e   : > { %v949_v4 = vpop.xlane.xlu1 %948 }
 0x31f   : > { %v950_v6 = vsub.f32 %v942_v49, %v949_v4 }
 0x320   : > { %v1514_v7 = vpop.eup %1513 }
 0x321   : > { %v951_v8 = vmul.f32 1.442695, %v950_v6  ;;  %v707_v9 = vsel %vm537_vm4, %v1514_v7, 0.0  ;;  %v711_v10 = vpack.c.bf16 %v1514_v7, %v1514_v7 }
 0x322   : > { %708 = vadd.xlane.f32.xlu0 %v707_v9 }
 0x323   : > { %1517 = vpow2.f32 %v951_v8  ;;  %1366 = vmatmul.mubr.msk.bf16.vlgmr.msra.gmra.mxu1 %vm537_vm4, %v711_v10 }
 0x324   : > { %1376 = vmatpush3.bf16.msra.mxu1 %v841_v11  ;;  %1377 = vmatprep.mubr.msk.bf16.mxu1 %vm1761_vm0, %v1760_v0 }
 0x325   : > { %1387 = vmatprep.subr.bf16.mxu1 %v1760_v0 }
 0x328   : > { %v1516_v13 = vpop.eup %1515 }
 0x329   : > { %v830_v14 = vsel %vm537_vm4, %v1516_v13, 0.0  ;;  %v834_v15 = vpack.c.bf16 %v1516_v13, %v1516_v13 }
 0x32a   : > { %831 = vadd.xlane.f32.xlu1 %v830_v14 }
 0x32b   : > { %1378 = vmatmul.mubr.msk.bf16.vlgmr.msra.gmra.mxu1 %vm537_vm4, %v834_v15 }
 0x32c   : > { %1388 = vmatpush3.bf16.msra.mxu1 %v964_v16  ;;  %1389 = vmatprep.mubr.msk.bf16.mxu1 %vm1761_vm0, %v1760_v0 }
 0x32e   : > { %592 = vadd.xlane.f32.xlu1 %v591_v17 }
 0x330   : > { %v1518_v18 = vpop.eup %1517 }
 0x331   : > { %v953_v19 = vsel %vm537_vm4, %v1518_v18, 0.0  ;;  %v957_v20 = vpack.c.bf16 %v1518_v18, %v1518_v18 }
 0x332   : > { %954 = vadd.xlane.f32.xlu0 %v953_v19 }
 0x333   : > { %1390 = vmatmul.mubr.msk.bf16.vlgmr.msra.gmra.mxu1 %vm537_vm4, %v957_v20 }
 0x36e   : > { %v637_v21 = vpop.f32.mrf.mxu1 }
 0x370   : > { %v1355_v22 = vpop.f32.mrf.mxu1 }
 0x372   : > { %v640_v23 = vpop.f32.mrf.mxu1 }
 0x374   : > { %v1356_v24 = vpop.f32.mrf.mxu1 }
 0x3ab   : > { %v709_v30 = vpop.xlane.xlu0 %708 }
 0x3b3   : > { %v832_v25 = vpop.xlane.xlu1 %831 }
 0x3b7   : > { %v593_v26 = vpop.xlane.xlu1 %592 }
 0x3b8   : > { %1519 = vrcp.f32 %v593_v26 }
 0x3b9   : > { %1521 = vrcp.f32 %v709_v30 }
 0x3ba   : > { %1523 = vrcp.f32 %v832_v25 }
 0x3bb   : > { %v955_v32 = vpop.xlane.xlu0 %954 }
 0x3bc   : > { %1525 = vrcp.f32 %v955_v32 }
 0x3c5   : > { %v1520_v27 = vpop.eup %1519 }
 0x3c6   : > { %v643_v28 = vmul.f32 %v1520_v27, %v637_v21  ;;  %v1522_v31 = vpop.eup %1521 }
 0x3c7   : > { %v1524_v39 = vpop.eup %1523 }
 0x3c8   : > { %v644_v29 = vpack.c.bf16 %v643_v28, %v643_v28 }
 0x3c9   : > { %v1526_v48 = vpop.eup %1525 }
 0x3ca   : > { %646 = vst.msk [vmem:[#allocation3] sm:$0xf] %vm645_vm5, %v644_v29 }
 0x3e3   : > { %v754_v33 = vpop.f32.mrf.mxu1 }
 0x3e4   : > { %v760_v34 = vmul.f32 %v1522_v31, %v754_v33 }
 0x3e5   : > { %v1367_v35 = vpop.f32.mrf.mxu1 }
 0x3e6   : > { %v1312_v36 = vpack.c.bf16 %v760_v34, %v760_v34 }
 0x3e7   : > { %v757_v37 = vpop.f32.mrf.mxu1 }
 0x3e8   : > { %765 = vrot.lane.b32.xlu0 %v1312_v36, %s1765_s4 }
 0x3e9   : > { %v1368_v38 = vpop.f32.mrf.mxu1 }
 0x3eb   : > { %v877_v40 = vpop.f32.mrf.mxu1 }
 0x3ec   : > { %v883_v42 = vmul.f32 %v1524_v39, %v877_v40 }
 0x3ed   : > { %v1379_v43 = vpop.f32.mrf.mxu1 }
 0x3ee   : > { %v1313_v45 = vpack.c.bf16 %v883_v42, %v883_v42 }
 0x3ef   : > { %v880_v46 = vpop.f32.mrf.mxu1 }
 0x3f0   : > { %888 = vrot.lane.b32.xlu1 %v1313_v45, %s1766_s8 }
 0x3f1   : > { %v1380_v47 = vpop.f32.mrf.mxu1 }
 0x3f3   : > { %v1000_v49 = vpop.f32.mrf.mxu1 }
 0x3f4   : > { %v1006_v50 = vmul.f32 %v1526_v48, %v1000_v49 }
 0x3f5   : > { %v1391_v51 = vpop.f32.mrf.mxu1 }
 0x3f6   : > { %v1314_v52 = vpack.c.bf16 %v1006_v50, %v1006_v50 }
 0x3f7   : > { %v1003_v53 = vpop.f32.mrf.mxu1 }
 0x3f8   : > { %1011 = vrot.lane.b32.xlu1 %v1314_v52, %s1767_s23 }
 0x3f9   : > { %v1392_v54 = vpop.f32.mrf.mxu1 }
 0x45a   : > { %v766_v55 = vpop.permute.xlu0 %765 }
 0x45b   : > { %769 = vst.msk [vmem:[#allocation3] sm:$0xf] %vm768_vm6, %v766_v55 }
 0x462   : > { %v889_v0 = vpop.permute.xlu1 %888 }
 0x463   : > { %892 = vst.msk [vmem:[#allocation3] sm:$0xf] %vm891_vm7, %v889_v0 }
 0x46a   : > { %v1012_v56 = vpop.permute.xlu1 %1011 }
 0x46b   : > { %1015 = vst.msk [vmem:[#allocation3] sm:$0xf] %vm1014_vm8, %v1012_v56 }
 0x472   : > { %v1016_v57 = vld [vmem:[#allocation3] sm:$0xf] }
 0x473   : > { %1398 = vmatmul.mubr.msk.bf16.vlgmr.msra.gmra.mxu0 %vm486_vm1, %v1016_v57 }
 0x533   : > { %v1077_v59 = vpop.f32.mrf.mxu0 }
 0x534   : > { %v1078_v60 = vadd.f32 %v1302_v58, %v1077_v59 }
 0x535   : > { %v1399_v61 = vpop.f32.mrf.mxu0 }
 0x536   : > { %1083 = vst.msk [vmem:[%s456_s1] sm:$0xff] %vm486_vm1, %v1078_v60 }
 0x537   : > { %v1080_v62 = vpop.f32.mrf.mxu0 }
 0x538   : > { %1676 = shalt.err (!%p1673_p6)
}
 0x539   : > { %s1677_s22 = scalar_lea.hbm %s2097_s11, 128  ;;  %s1681_s4 = scalar_lea.hbm %s2195_s19, 256 }
 0x53a   : > { %p1678_p1 = scmp.ne.s32.totalorder %s2097_s11, %s1677_s22  ;;  %p1682_p10 = scmp.lt.s32.totalorder %s2097_s11, %s2195_s19 }
 0x53b   : > { %p1683_p12 = scmp.lt.s32.totalorder %s1681_s4, %s1677_s22 }
 0x53c   : > { %p1679_p2 = pnand %p1678_p1, %p1866_p8 }
 0x53d   : > { %p1684_p9 = por %p1683_p12, %p1682_p10 }
 0x53e   : > { %p1680_p4 = pneg %p1679_p2 }
 0x540   : > { %p1685_p7 = pnand %p1684_p9, %p1680_p4 }
 0x542   : > { %1688 = shalt.err (!%p1685_p7)
}
 0x543   : > { %1415 = dma.vmem_to_hbm [thread:$0]  (%p1866_p8), %s2099_s13, 128, %s2097_s11, %s1085_s15   ;;  %v1400_v63 = vpop.f32.mrf.mxu0 }
 0x544 PF: > { %s2196_s14 = sld [smem:[#allocation18_spill]]  ;;  %p2199_p11 = scmp.ge.s32.totalorder %s1751_s10, 2 }
 0x545   : > { %s2197_s2 = sld [smem:[#allocation20_spill]] }
 0x54a   : > { %s1111_s25 = sand.u32 1, %s2196_s14  }
 0x54b   : > { %p2198_p5 = scmp.ne.s32.totalorder %s2197_s2, 0  ;;  %s1112_s27 = scalar_lea.sflag [#allocation6], %s1111_s25 }
 0x54d   : > { %p1435_p13 = pnand %p2199_p11, %p2198_p5 }
 0x54f   : > { %p1436_p3 = pneg %p1435_p13 }
 0x551   : > { %1726 = dma.done.wait (%p1436_p3), %s1112_s27, 128  }
 0x552   : > { %1728 = vsyncadd (%p1436_p3), %s1112_s27, 4294967168  ;;  %s28_s10 = sadd.s32 1, %s1751_s10   ;;  %s2200_s26 = sld [smem:[#allocation22_spill]] }
 0x553   : > { %p25_p0 = scmp.ge.s32.totalorder %s28_s10, 4   ;;  %s2201_s21 = sld [smem:[#allocation21_spill]] }
 0x554   : > { %s2202_s27 = smov %s1735_s28  ;;  %s2203_s28 = smov %s1739_s29 }
 0x555   : > { %s2205_s30 = smov %s1747_s9  ;;  %27 = sbr.rel (!%p25_p0) target bundleno = 15 (0xf), region = 138 }
 0x558   : > { %s2204_s29 = smov %s2200_s26 }
 0x559   : > { %s2206_s9 = smov %s2201_s21 }
 0x55a   :  { %1117 = vsyncpa [#allocation5], 1 }
 0x55b   :  { %1119 = vsyncpa [#allocation5 + $0x1], 1 }
 0x55c   :  { %1120 = vsyncpa [#allocation8], 1 }
 0x55d   :  { %1122 = vsyncpa [#allocation8 + $0x1], 1 }
 0x55e   :  { %1123 = vsyncpa [#allocation11], 1 }
 0x55f   :  { %1124 = vsyncpa [#allocation6], 1 }
 0x560   :  { %1126 = vsyncpa [#allocation6 + $0x1], 1 }

</bundles_post_ra>
